<compile_context>
chip_gen: v7x
topology: tpu7x:2x2x1
jax: 0.10.0
libtpu: 0.0.40
codegen_flags: <defaults>
</compile_context>

<pallas_src>
import jax
import jax.numpy as jnp
from jax.experimental import pallas as pl
from jax.experimental.pallas import tpu as pltpu


def ffcse_kernel(xl_ref, xg_ref, wpl_ref, wpg_ref, b1_ref, ol_ref, og_ref):
    # xl_ref: (B, Cl, HW)   xg_ref: (B, Cg, HW)
    # wpl_ref: (Cl, 2*mid+1) = [ w1_l^T | w2l | b2l ]
    # wpg_ref: (Cg, 2*mid+1) = [ w1_g^T | w2g | b2g ]
    # b1_ref : (1, mid)
    hw = xl_ref.shape[-1]
    mid = b1_ref.shape[-1]
    inv_hw = 1.0 / hw

    # Load once; do all squeeze/gate math in f32 (single upcast; v5e-safe).
    xl = xl_ref[...].astype(jnp.float32)        # (B, Cl, HW)
    xg = xg_ref[...].astype(jnp.float32)        # (B, Cg, HW)

    # AdaptiveAvgPool2d((1,1)): cross-lane (XLU) sum over spatial, scaled once.
    pool_l = jnp.sum(xl, axis=-1, keepdims=True) * inv_hw   # (B, Cl, 1)
    pool_g = jnp.sum(xg, axis=-1, keepdims=True) * inv_hw   # (B, Cg, 1)

    wp_l = wpl_ref[...]                          # (Cl, 2*mid+1)
    wp_g = wpg_ref[...]                          # (Cg, 2*mid+1)
    w1_lT = wp_l[:, :mid]                        # (Cl, mid)
    w2l = wp_l[:, mid:2 * mid]                   # (Cl, mid)
    b2l = wp_l[:, 2 * mid:]                      # (Cl, 1)
    w1_gT = wp_g[:, :mid]                        # (Cg, mid)
    w2g = wp_g[:, mid:2 * mid]                   # (Cg, mid)
    b2g = wp_g[:, 2 * mid:]                      # (Cg, 1)

    # conv1 (1x1) + ReLU as VPU broadcast-mul + sublane reduction (no MXU):
    #   hidden[b, m] = sum_c w1[m,c] * pool[b,c] + b1[m]
    h = (jnp.sum(pool_l * w1_lT[None, :, :], axis=1, keepdims=True)
         + jnp.sum(pool_g * w1_gT[None, :, :], axis=1, keepdims=True)
         + b1_ref[...][None, :, :])              # (B, 1, mid)
    hidden = jnp.maximum(h, 0.0)

    # conv_a2l / conv_a2g (1x1) + sigmoid, gates land directly in the
    # sublane-per-channel layout needed for the final broadcast multiply.
    a_l = jax.nn.sigmoid(
        jnp.sum(hidden * w2l[None, :, :], axis=-1, keepdims=True)
        + b2l[None, :, :])                       # (B, Cl, 1)
    a_g = jax.nn.sigmoid(
        jnp.sum(hidden * w2g[None, :, :], axis=-1, keepdims=True)
        + b2g[None, :, :])                       # (B, Cg, 1)

    # x_l = id_l * gate_l ; x_g = id_g * gate_g  (lane broadcast over spatial)
    ol_ref[...] = (xl * a_l).astype(ol_ref.dtype)
    og_ref[...] = (xg * a_g).astype(og_ref.dtype)


def _pack_params(params, in_cl):
    """Squeeze 1x1-conv params into 3 small f32 arrays (fewer input refs)."""
    w1, b1, w2l, b2l, w2g, b2g = params          # (mid,C),(mid,),(Cl,mid),(Cl,),(Cg,mid),(Cg,)
    w1_lT = w1[:, :in_cl].T                      # (Cl, mid)
    w1_gT = w1[:, in_cl:].T                      # (Cg, mid)
    wp_l = jnp.concatenate([w1_lT, w2l, b2l[:, None]], axis=1).astype(jnp.float32)
    wp_g = jnp.concatenate([w1_gT, w2g, b2g[:, None]], axis=1).astype(jnp.float32)
    b1_row = b1[None, :].astype(jnp.float32)     # (1, mid)
    return wp_l, wp_g, b1_row


@jax.jit
def ffcse_block(id_l, id_g, params):
    """id_l: (B, Cl, H, W), id_g: (B, Cg, H, W)  ->  (x_l, x_g) same shapes."""
    B, Cl, H, W = id_l.shape
    Cg = id_g.shape[1]
    HW = H * W
    xl = id_l.reshape(B, Cl, HW)
    xg = id_g.reshape(B, Cg, HW)
    wp_l, wp_g, b1_row = _pack_params(params, Cl)

    out_l, out_g = pl.pallas_call(
        ffcse_kernel,
        out_shape=(jax.ShapeDtypeStruct((B, Cl, HW), id_l.dtype),
                   jax.ShapeDtypeStruct((B, Cg, HW), id_g.dtype)),
        grid_spec=pltpu.PrefetchScalarGridSpec(
            num_scalar_prefetch=0,
            grid=(1,),   # single step: whole problem fits in VMEM at these shapes
            in_specs=[pl.BlockSpec((B, Cl, HW), lambda i: (0, 0, 0)),
                      pl.BlockSpec((B, Cg, HW), lambda i: (0, 0, 0)),
                      pl.BlockSpec(wp_l.shape, lambda i: (0, 0)),
                      pl.BlockSpec(wp_g.shape, lambda i: (0, 0)),
                      pl.BlockSpec(b1_row.shape, lambda i: (0, 0))],
            out_specs=[pl.BlockSpec((B, Cl, HW), lambda i: (0, 0, 0)),
                       pl.BlockSpec((B, Cg, HW), lambda i: (0, 0, 0))]),
        compiler_params=pltpu.CompilerParams(
            dimension_semantics=("arbitrary",)),
        # Pure elementwise in-place gating: reuse the input HBM buffers.
        input_output_aliases={0: 0, 1: 1},
    )(xl, xg, wp_l, wp_g, b1_row)

    return out_l.reshape(B, Cl, H, W), out_g.reshape(B, Cg, H, W)


def ffcse_reference(id_l, id_g, params):
    """Plain-JAX reference mirroring the PyTorch forward exactly."""
    w1, b1, w2l, b2l, w2g, b2g = params
    x_cat = jnp.concatenate([id_l, id_g], axis=1)            # (B, C, H, W)
    pooled = jnp.mean(x_cat, axis=(2, 3))                    # (B, C)
    hidden = jnp.maximum(pooled @ w1.T + b1, 0.0)            # (B, mid)
    a_l = jax.nn.sigmoid(hidden @ w2l.T + b2l)               # (B, Cl)
    a_g = jax.nn.sigmoid(hidden @ w2g.T + b2g)               # (B, Cg)
    x_l = id_l * a_l[:, :, None, None]
    x_g = id_g * a_g[:, :, None, None]
    return x_l, x_g


if __name__ == "__main__":
    # Module config: channels=64, ratio_g=0.5 -> in_cg=32, in_cl=32, mid=channels//16=4
    channels, ratio_g = 64, 0.5
    in_cg = int(channels * ratio_g)
    in_cl = channels - in_cg
    mid = channels // 16
    B, H, W = 2, 16, 16

    key = jax.random.PRNGKey(0)
    k = jax.random.split(key, 8)
    id_l = jax.random.normal(k[0], (B, in_cl, H, W), jnp.float32)
    id_g = jax.random.normal(k[1], (B, in_cg, H, W), jnp.float32)

    # 1x1 conv weights squeezed to 2-D matrices, biases as 1-D vectors.
    w1 = jax.random.normal(k[2], (mid, channels), jnp.float32) * 0.1
    b1 = jax.random.normal(k[3], (mid,), jnp.float32) * 0.1
    w2l = jax.random.normal(k[4], (in_cl, mid), jnp.float32) * 0.1
    b2l = jax.random.normal(k[5], (in_cl,), jnp.float32) * 0.1
    w2g = jax.random.normal(k[6], (in_cg, mid), jnp.float32) * 0.1
    b2g = jax.random.normal(k[7], (in_cg,), jnp.float32) * 0.1
    params = (w1, b1, w2l, b2l, w2g, b2g)

    # Reference first (kernel aliases its inputs into its outputs).
    ref_l, ref_g = ffcse_reference(id_l, id_g, params)

    x_l, x_g = ffcse_block(id_l, id_g, params)
    jax.block_until_ready((x_l, x_g))

    assert jnp.allclose(x_l, ref_l, atol=1e-5, rtol=1e-5)
    assert jnp.allclose(x_g, ref_g, atol=1e-5, rtol=1e-5)

    print("KERNEL_OK")
</pallas_src>

<mosaic_0001>
module attributes {stable_mosaic.version = 11 : i64} {
  func.func @ffcse_kernel(%arg0: i32, %arg1: memref<2x32x256xf32, #tpu.memory_space<vmem>>, %arg2: memref<2x32x256xf32, #tpu.memory_space<vmem>>, %arg3: memref<32x9xf32, #tpu.memory_space<vmem>>, %arg4: memref<32x9xf32, #tpu.memory_space<vmem>>, %arg5: memref<1x4xf32, #tpu.memory_space<vmem>>, %arg6: memref<2x32x256xf32, #tpu.memory_space<vmem>>, %arg7: memref<2x32x256xf32, #tpu.memory_space<vmem>>) attributes {dimension_semantics = [#tpu.dimension_semantics<arbitrary>], iteration_bounds = array<i64: 1>, scalar_prefetch = 0 : i64, scratch_operands = 0 : i64, tpu.core_type = #tpu.core_type<tc>, window_params = [{pipeline_mode = #tpu.pipeline_mode<synchronous>, transform_indices = @transform_0, window_bounds = array<i64: 2, 32, 256>}, {pipeline_mode = #tpu.pipeline_mode<synchronous>, transform_indices = @transform_1, window_bounds = array<i64: 2, 32, 256>}, {pipeline_mode = #tpu.pipeline_mode<synchronous>, transform_indices = @transform_2, window_bounds = array<i64: 32, 9>}, {pipeline_mode = #tpu.pipeline_mode<synchronous>, transform_indices = @transform_3, window_bounds = array<i64: 32, 9>}, {pipeline_mode = #tpu.pipeline_mode<synchronous>, transform_indices = @transform_4, window_bounds = array<i64: 1, 4>}, {pipeline_mode = #tpu.pipeline_mode<synchronous>, transform_indices = @transform_5, window_bounds = array<i64: 2, 32, 256>}, {pipeline_mode = #tpu.pipeline_mode<synchronous>, transform_indices = @transform_6, window_bounds = array<i64: 2, 32, 256>}]} {
    %c0 = arith.constant 0 : index
    %c0_0 = arith.constant 0 : index
    %c0_1 = arith.constant 0 : index
    %0 = vector.load %arg1[%c0, %c0_0, %c0_1] : memref<2x32x256xf32, #tpu.memory_space<vmem>>, vector<2x32x256xf32>
    %c0_2 = arith.constant 0 : index
    %c0_3 = arith.constant 0 : index
    %c0_4 = arith.constant 0 : index
    %1 = vector.load %arg2[%c0_2, %c0_3, %c0_4] : memref<2x32x256xf32, #tpu.memory_space<vmem>>, vector<2x32x256xf32>
    %cst = arith.constant dense<0.000000e+00> : vector<2x32xf32>
    %2 = vector.multi_reduction <add>, %0, %cst [2] : vector<2x32x256xf32> to vector<2x32xf32>
    %3 = vector.shape_cast %2 : vector<2x32xf32> to vector<2x32x1xf32>
    %cst_5 = arith.constant 3.906250e-03 : f32
    %4 = vector.broadcast %cst_5 : f32 to vector<2x32x1xf32>
    %5 = arith.mulf %3, %4 : vector<2x32x1xf32>
    %cst_6 = arith.constant dense<0.000000e+00> : vector<2x32xf32>
    %6 = vector.multi_reduction <add>, %1, %cst_6 [2] : vector<2x32x256xf32> to vector<2x32xf32>
    %7 = vector.shape_cast %6 : vector<2x32xf32> to vector<2x32x1xf32>
    %cst_7 = arith.constant 3.906250e-03 : f32
    %8 = vector.broadcast %cst_7 : f32 to vector<2x32x1xf32>
    %9 = arith.mulf %7, %8 : vector<2x32x1xf32>
    %c0_8 = arith.constant 0 : index
    %c0_9 = arith.constant 0 : index
    %10 = vector.load %arg3[%c0_8, %c0_9] : memref<32x9xf32, #tpu.memory_space<vmem>>, vector<32x9xf32>
    %c0_10 = arith.constant 0 : index
    %c0_11 = arith.constant 0 : index
    %11 = vector.load %arg4[%c0_10, %c0_11] : memref<32x9xf32, #tpu.memory_space<vmem>>, vector<32x9xf32>
    %12 = vector.extract_strided_slice %10 {offsets = [0, 0], sizes = [32, 4], strides = [1, 1]} : vector<32x9xf32> to vector<32x4xf32>
    %13 = vector.extract_strided_slice %10 {offsets = [0, 4], sizes = [32, 4], strides = [1, 1]} : vector<32x9xf32> to vector<32x4xf32>
    %14 = vector.extract_strided_slice %10 {offsets = [0, 8], sizes = [32, 1], strides = [1, 1]} : vector<32x9xf32> to vector<32x1xf32>
    %15 = vector.extract_strided_slice %11 {offsets = [0, 0], sizes = [32, 4], strides = [1, 1]} : vector<32x9xf32> to vector<32x4xf32>
    %16 = vector.extract_strided_slice %11 {offsets = [0, 4], sizes = [32, 4], strides = [1, 1]} : vector<32x9xf32> to vector<32x4xf32>
    %17 = vector.extract_strided_slice %11 {offsets = [0, 8], sizes = [32, 1], strides = [1, 1]} : vector<32x9xf32> to vector<32x1xf32>
    %18 = vector.shape_cast %12 : vector<32x4xf32> to vector<1x32x4xf32>
    %19 = vector.broadcast %5 : vector<2x32x1xf32> to vector<2x32x4xf32>
    %20 = vector.broadcast %18 : vector<1x32x4xf32> to vector<2x32x4xf32>
    %21 = arith.mulf %19, %20 : vector<2x32x4xf32>
    %cst_12 = arith.constant dense<0.000000e+00> : vector<2x4xf32>
    %22 = vector.multi_reduction <add>, %21, %cst_12 [1] : vector<2x32x4xf32> to vector<2x4xf32>
    %23 = vector.shape_cast %22 : vector<2x4xf32> to vector<2x1x4xf32>
    %24 = vector.shape_cast %15 : vector<32x4xf32> to vector<1x32x4xf32>
    %25 = vector.broadcast %9 : vector<2x32x1xf32> to vector<2x32x4xf32>
    %26 = vector.broadcast %24 : vector<1x32x4xf32> to vector<2x32x4xf32>
    %27 = arith.mulf %25, %26 : vector<2x32x4xf32>
    %cst_13 = arith.constant dense<0.000000e+00> : vector<2x4xf32>
    %28 = vector.multi_reduction <add>, %27, %cst_13 [1] : vector<2x32x4xf32> to vector<2x4xf32>
    %29 = vector.shape_cast %28 : vector<2x4xf32> to vector<2x1x4xf32>
    %30 = arith.addf %23, %29 : vector<2x1x4xf32>
    %c0_14 = arith.constant 0 : index
    %c0_15 = arith.constant 0 : index
    %31 = vector.load %arg5[%c0_14, %c0_15] : memref<1x4xf32, #tpu.memory_space<vmem>>, vector<1x4xf32>
    %32 = vector.shape_cast %31 : vector<1x4xf32> to vector<1x1x4xf32>
    %33 = vector.broadcast %32 : vector<1x1x4xf32> to vector<2x1x4xf32>
    %34 = arith.addf %30, %33 : vector<2x1x4xf32>
    %cst_16 = arith.constant 0.000000e+00 : f32
    %35 = vector.broadcast %cst_16 : f32 to vector<2x1x4xf32>
    %36 = arith.maximumf %34, %35 : vector<2x1x4xf32>
    %37 = vector.shape_cast %13 : vector<32x4xf32> to vector<1x32x4xf32>
    %38 = vector.broadcast %36 : vector<2x1x4xf32> to vector<2x32x4xf32>
    %39 = vector.broadcast %37 : vector<1x32x4xf32> to vector<2x32x4xf32>
    %40 = arith.mulf %38, %39 : vector<2x32x4xf32>
    %cst_17 = arith.constant dense<0.000000e+00> : vector<2x32xf32>
    %41 = vector.multi_reduction <add>, %40, %cst_17 [2] : vector<2x32x4xf32> to vector<2x32xf32>
    %42 = vector.shape_cast %41 : vector<2x32xf32> to vector<2x32x1xf32>
    %43 = vector.shape_cast %14 : vector<32x1xf32> to vector<1x32x1xf32>
    %44 = vector.broadcast %43 : vector<1x32x1xf32> to vector<2x32x1xf32>
    %45 = arith.addf %42, %44 : vector<2x32x1xf32>
    %46 = arith.negf %45 : vector<2x32x1xf32>
    %47 = math.exp %46 : vector<2x32x1xf32>
    %cst_18 = arith.constant 1.000000e+00 : f32
    %48 = vector.broadcast %cst_18 : f32 to vector<2x32x1xf32>
    %49 = arith.addf %48, %47 : vector<2x32x1xf32>
    %50 = arith.divf %48, %49 : vector<2x32x1xf32>
    %51 = vector.shape_cast %16 : vector<32x4xf32> to vector<1x32x4xf32>
    %52 = vector.broadcast %36 : vector<2x1x4xf32> to vector<2x32x4xf32>
    %53 = vector.broadcast %51 : vector<1x32x4xf32> to vector<2x32x4xf32>
    %54 = arith.mulf %52, %53 : vector<2x32x4xf32>
    %cst_19 = arith.constant dense<0.000000e+00> : vector<2x32xf32>
    %55 = vector.multi_reduction <add>, %54, %cst_19 [2] : vector<2x32x4xf32> to vector<2x32xf32>
    %56 = vector.shape_cast %55 : vector<2x32xf32> to vector<2x32x1xf32>
    %57 = vector.shape_cast %17 : vector<32x1xf32> to vector<1x32x1xf32>
    %58 = vector.broadcast %57 : vector<1x32x1xf32> to vector<2x32x1xf32>
    %59 = arith.addf %56, %58 : vector<2x32x1xf32>
    %60 = arith.negf %59 : vector<2x32x1xf32>
    %61 = math.exp %60 : vector<2x32x1xf32>
    %cst_20 = arith.constant 1.000000e+00 : f32
    %62 = vector.broadcast %cst_20 : f32 to vector<2x32x1xf32>
    %63 = arith.addf %62, %61 : vector<2x32x1xf32>
    %64 = arith.divf %62, %63 : vector<2x32x1xf32>
    %65 = vector.broadcast %50 : vector<2x32x1xf32> to vector<2x32x256xf32>
    %66 = arith.mulf %0, %65 : vector<2x32x256xf32>
    %c0_21 = arith.constant 0 : index
    %c0_22 = arith.constant 0 : index
    %c0_23 = arith.constant 0 : index
    %67 = vector.load %arg6[%c0_21, %c0_22, %c0_23] : memref<2x32x256xf32, #tpu.memory_space<vmem>>, vector<2x32x256xf32>
    tpu.vector_store %arg6[%c0_21, %c0_22, %c0_23], %66 {strides = array<i32>} : memref<2x32x256xf32, #tpu.memory_space<vmem>>, vector<2x32x256xf32>,
    %68 = vector.broadcast %64 : vector<2x32x1xf32> to vector<2x32x256xf32>
    %69 = arith.mulf %1, %68 : vector<2x32x256xf32>
    %c0_24 = arith.constant 0 : index
    %c0_25 = arith.constant 0 : index
    %c0_26 = arith.constant 0 : index
    %70 = vector.load %arg7[%c0_24, %c0_25, %c0_26] : memref<2x32x256xf32, #tpu.memory_space<vmem>>, vector<2x32x256xf32>
    tpu.vector_store %arg7[%c0_24, %c0_25, %c0_26], %69 {strides = array<i32>} : memref<2x32x256xf32, #tpu.memory_space<vmem>>, vector<2x32x256xf32>,
    return
  }
  func.func @transform_0(%arg0: i32) -> (i32, i32, i32) {
    %c0_i32 = arith.constant 0 : i32
    %c0_i32_0 = arith.constant 0 : i32
    %c0_i32_1 = arith.constant 0 : i32
    %c0_i32_2 = arith.constant 0 : i32
    return %c0_i32, %c0_i32_0, %c0_i32_1 : i32, i32, i32
  }
  func.func @transform_1(%arg0: i32) -> (i32, i32, i32) {
    %c0_i32 = arith.constant 0 : i32
    %c0_i32_0 = arith.constant 0 : i32
    %c0_i32_1 = arith.constant 0 : i32
    %c0_i32_2 = arith.constant 0 : i32
    return %c0_i32, %c0_i32_0, %c0_i32_1 : i32, i32, i32
  }
  func.func @transform_2(%arg0: i32) -> (i32, i32) {
    %c0_i32 = arith.constant 0 : i32
    %c0_i32_0 = arith.constant 0 : i32
    %c0_i32_1 = arith.constant 0 : i32
    return %c0_i32, %c0_i32_0 : i32, i32
  }
  func.func @transform_3(%arg0: i32) -> (i32, i32) {
    %c0_i32 = arith.constant 0 : i32
    %c0_i32_0 = arith.constant 0 : i32
    %c0_i32_1 = arith.constant 0 : i32
    return %c0_i32, %c0_i32_0 : i32, i32
  }
  func.func @transform_4(%arg0: i32) -> (i32, i32) {
    %c0_i32 = arith.constant 0 : i32
    %c0_i32_0 = arith.constant 0 : i32
    %c0_i32_1 = arith.constant 0 : i32
    return %c0_i32, %c0_i32_0 : i32, i32
  }
  func.func @transform_5(%arg0: i32) -> (i32, i32, i32) {
    %c0_i32 = arith.constant 0 : i32
    %c0_i32_0 = arith.constant 0 : i32
    %c0_i32_1 = arith.constant 0 : i32
    %c0_i32_2 = arith.constant 0 : i32
    return %c0_i32, %c0_i32_0, %c0_i32_1 : i32, i32, i32
  }
  func.func @transform_6(%arg0: i32) -> (i32, i32, i32) {
    %c0_i32 = arith.constant 0 : i32
    %c0_i32_0 = arith.constant 0 : i32
    %c0_i32_1 = arith.constant 0 : i32
    %c0_i32_2 = arith.constant 0 : i32
    return %c0_i32, %c0_i32_0, %c0_i32_1 : i32, i32, i32
  }
}

</mosaic_0001>

<bundles_post_ra>
// kernel: ffcse_block.1
= control target key start
LH: loop header
LB: loop body
LE: loop exit
PB: predicated region body
PF: predicated region fallthrough
CT: control target
= control target key end

     0   :  { %s654_s14 = smov 124   ;;  %vm134_vm0 = vcmask 31744   ;;  %s1126_s0 = inlined_call_operand.vmem [shape: f32[2,32,256], index: 0, kind: input, shape index: {}, may-alias: {0,5}]   ;;  %s1127_s1 = inlined_call_operand.vmem [shape: f32[2,32,256], index: 1, kind: input, shape index: {}, may-alias: {1,6}]   ;;  %s1128_s2 = inlined_call_operand.vmem [shape: f32[32,9], index: 2, kind: input, shape index: {}]   ;;  %s1129_s3 = inlined_call_operand.vmem [shape: f32[32,9], index: 3, kind: input, shape index: {}]   ;;  %s1130_s4 = inlined_call_operand.vmem [shape: f32[1,4], index: 4, kind: input, shape index: {}]   ;;  %s1131_s5 = inlined_call_operand.vmem [shape: f32[2,32,256], index: 5, kind: output, shape index: {0}, may-alias: {0,5}]   ;;  %s1132_s6 = inlined_call_operand.vmem [shape: f32[2,32,256], index: 6, kind: output, shape index: {1}, may-alias: {1,6}]  }
   0x1   :  { %v694_v0 = vld [vmem:[%s1126_s0 + $0x40] sm:$0xff]  ;;  %v699_v1 = vld [vmem:[%s1126_s0 + $0x48] sm:$0xff]  ;;  %v716_v5 = vld [vmem:[%s1126_s0 + $0x50] sm:$0xff] }
   0x2   :  { %v704_v2 = vld [vmem:[%s1126_s0] sm:$0xff]  ;;  %v66_v3 = vadd.f32 %v699_v1, %v694_v0  ;;  %v711_v4 = vld [vmem:[%s1126_s0 + $0x8] sm:$0xff]  ;;  %v721_v6 = vld [vmem:[%s1126_s0 + $0x58] sm:$0xff] }
   0x3   :  { %v54_v7 = vadd.f32 %v711_v4, %v704_v2  ;;  %v728_v8 = vld [vmem:[%s1126_s0 + $0x10] sm:$0xff]  ;;  %v733_v9 = vld [vmem:[%s1126_s0 + $0x18] sm:$0xff]  ;;  %v69_v10 = vadd.f32 %v721_v6, %v716_v5  ;;  %v752_v14 = vld [vmem:[%s1127_s1] sm:$0xff] }
   0x4   :  { %67 = vadd.xlane.f32.xlu1 %v66_v3  ;;  %v57_v11 = vadd.f32 %v733_v9, %v728_v8  ;;  %v742_v12 = vld [vmem:[%s1127_s1 + $0x10] sm:$0xff]  ;;  %v747_v13 = vld [vmem:[%s1127_s1 + $0x18] sm:$0xff]  ;;  %v757_v15 = vld [vmem:[%s1127_s1 + $0x8] sm:$0xff] }
   0x5   :  { %55 = vadd.xlane.f32.xlu0 %v54_v7  ;;  %v89_v16 = vadd.f32 %v747_v13, %v742_v12  ;;  %v86_v17 = vadd.f32 %v757_v15, %v752_v14  ;;  %v766_v18 = vld [vmem:[%s1127_s1 + $0x50] sm:$0xff]  ;;  %v771_v19 = vld [vmem:[%s1127_s1 + $0x58] sm:$0xff]  ;;  %v776_v20 = vld [vmem:[%s1127_s1 + $0x40] sm:$0xff] }
   0x6   :  { %v781_v21 = vld [vmem:[%s1127_s1 + $0x48] sm:$0xff]  ;;  %v101_v22 = vadd.f32 %v771_v19, %v766_v18  ;;  %v790_v24 = vld [vmem:[%s1126_s0 + $0x60] sm:$0xff]  ;;  %v838_v36 = vld [vmem:[%s1126_s0 + $0x70] sm:$0xff] }
   0x7   :  { %1136 = vst [vmem:[#allocation2_spill] sm:$0xff] %v781_v21  ;;  %v98_v23 = vadd.f32 %v781_v21, %v776_v20  ;;  %v795_v25 = vld [vmem:[%s1126_s0 + $0x68] sm:$0xff]  ;;  %v800_v26 = vld [vmem:[%s1126_s0 + $0x20] sm:$0xff]  ;;  %v843_v37 = vld [vmem:[%s1126_s0 + $0x78] sm:$0xff] }
   0x8   :  { %70 = vadd.xlane.f32.xlu1 %v69_v10  ;;  %v805_v27 = vld [vmem:[%s1126_s0 + $0x28] sm:$0xff]  ;;  %v72_v28 = vadd.f32 %v795_v25, %v790_v24  ;;  %v814_v30 = vld [vmem:[%s1127_s1 + $0x60] sm:$0xff]  ;;  %v848_v38 = vld [vmem:[%s1126_s0 + $0x30] sm:$0xff]  ;;  %v75_v40 = vadd.f32 %v843_v37, %v838_v36 }
   0x9   :  { %58 = vadd.xlane.f32.xlu0 %v57_v11  ;;  %v60_v29 = vadd.f32 %v805_v27, %v800_v26  ;;  %1137 = vst [vmem:[#allocation3_spill] sm:$0xff] %v814_v30  ;;  %v819_v31 = vld [vmem:[%s1127_s1 + $0x68] sm:$0xff]  ;;  %v824_v32 = vld [vmem:[%s1127_s1 + $0x20] sm:$0xff]  ;;  %v853_v39 = vld [vmem:[%s1126_s0 + $0x38] sm:$0xff] }
   0xa   :  { %1138 = vst [vmem:[#allocation4_spill] sm:$0xff] %v819_v31  ;;  %v829_v33 = vld [vmem:[%s1127_s1 + $0x28] sm:$0xff]  ;;  %v104_v34 = vadd.f32 %v819_v31, %v814_v30  ;;  %v63_v41 = vadd.f32 %v853_v39, %v848_v38  ;;  %v862_v42 = vld [vmem:[%s1127_s1 + $0x70] sm:$0xff]  ;;  %v867_v43 = vld [vmem:[%s1127_s1 + $0x78] sm:$0xff] }
   0xb   :  { %v92_v35 = vadd.f32 %v829_v33, %v824_v32  ;;  %v872_v44 = vld [vmem:[%s1127_s1 + $0x30] sm:$0xff]  ;;  %v877_v45 = vld [vmem:[%s1127_s1 + $0x38] sm:$0xff]  ;;  %v107_v46 = vadd.f32 %v867_v43, %v862_v42  ;;  %v886_v48 = vld [vmem:[%s1128_s2 + $0x8] sm:$0xff] }
   0xc   :  { %90 = vadd.xlane.f32.xlu1 %v89_v16  ;;  %v95_v47 = vadd.f32 %v877_v45, %v872_v44  ;;  %v892_v49 = vld [vmem:[%s1128_s2 + $0x10] sm:$0xff]  ;;  %v897_v50 = vld [vmem:[%s1128_s2] sm:$0xff]  ;;  %v903_v51 = vld [vmem:[%s1128_s2 + $0x18] sm:$0xff] }
   0xd   :  { %87 = vadd.xlane.f32.xlu0 %v86_v17  ;;  %v909_v52 = vld [vmem:[%s1129_s3] sm:$0xff]  ;;  %v915_v53 = vld [vmem:[%s1129_s3 + $0x8] sm:$0xff]  ;;  %v921_v54 = vld [vmem:[%s1129_s3 + $0x10] sm:$0xff] }
   0xe   :  { %v927_v55 = vld [vmem:[%s1129_s3 + $0x18] sm:$0xff] }
  0x10   :  { %102 = vadd.xlane.f32.xlu1 %v101_v22 }
  0x11   :  { %99 = vadd.xlane.f32.xlu0 %v98_v23 }
  0x14   :  { %73 = vadd.xlane.f32.xlu1 %v72_v28 }
  0x15   :  { %61 = vadd.xlane.f32.xlu0 %v60_v29 }
  0x18   :  { %105 = vadd.xlane.f32.xlu1 %v104_v34 }
  0x19   :  { %93 = vadd.xlane.f32.xlu0 %v92_v35 }
  0x1c   :  { %76 = vadd.xlane.f32.xlu1 %v75_v40 }
  0x1d   :  { %64 = vadd.xlane.f32.xlu0 %v63_v41 }
  0x20   :  { %108 = vadd.xlane.f32.xlu1 %v107_v46 }
  0x21   :  { %96 = vadd.xlane.f32.xlu0 %v95_v47 }
  0x31   :  { %216 = vrot.lane.b32.xlu1 %v886_v48, %s654_s14 }
  0x35   :  { %218 = vrot.lane.b32.xlu1 %v892_v49, %s654_s14 }
  0x37   :  { %214 = vrot.lane.b32.xlu0 %v897_v50, %s654_s14 }
  0x39   :  { %220 = vrot.lane.b32.xlu1 %v903_v51, %s654_s14 }
  0x3b   :  { %318 = vrot.lane.b32.xlu0 %v909_v52, %s654_s14 }
  0x3d   :  { %320 = vrot.lane.b32.xlu1 %v915_v53, %s654_s14 }
  0x3f   :  { %322 = vrot.lane.b32.xlu0 %v921_v54, %s654_s14 }
  0x41   :  { %324 = vrot.lane.b32.xlu1 %v927_v55, %s654_s14 }
  0x91   :  { %v68_v56 = vpop.xlane.xlu1 %67 }
  0x92   :  { %v56_v57 = vpop.xlane.xlu0 %55  ;;  %v82_v3 = vmul.f32 0.00390625, %v68_v56 }
  0x93   :  { %v78_v10 = vmul.f32 0.00390625, %v56_v57 }
  0x94   :  { %v130_v34 = vmul.f32 %v897_v50, %v82_v3 }
  0x95   :  { %v71_v58 = vpop.xlane.xlu1 %70  ;;  %v126_v41 = vmul.f32 %v897_v50, %v78_v10 }
  0x96   :  { %v59_v59 = vpop.xlane.xlu0 %58  ;;  %v83_v7 = vmul.f32 0.00390625, %v71_v58 }
  0x97   :  { %v79_v11 = vmul.f32 0.00390625, %v59_v59 }
  0x98   :  { %v131_v35 = vmul.f32 %v886_v48, %v83_v7 }
  0x99   :  { %v91_v60 = vpop.xlane.xlu1 %90  ;;  %v127_v46 = vmul.f32 %v886_v48, %v79_v11 }
  0x9a   :  { %v88_v61 = vpop.xlane.xlu0 %87  ;;  %v111_v40 = vmul.f32 0.00390625, %v91_v60  ;;  %v148_v60 = vsel %vm134_vm0, %v130_v34, 0.0  ;;  %v149_v7 = vsel %vm134_vm0, %v131_v35, 0.0 }
  0x9b   :  { %v110_v47 = vmul.f32 0.00390625, %v88_v61  ;;  %v135_v61 = vsel %vm134_vm0, %v126_v41, 0.0  ;;  %v136_v11 = vsel %vm134_vm0, %v127_v46, 0.0  ;;  %v150_v35 = vadd.f32 %v149_v7, %v148_v60 }
  0x9c   :  { %v162_v10 = vmul.f32 %v915_v53, %v111_v40  ;;  %v137_v46 = vadd.f32 %v136_v11, %v135_v61 }
  0x9d   :  { %v103_v62 = vpop.xlane.xlu1 %102 }
  0x9e   :  { %v100_v63 = vpop.xlane.xlu0 %99  ;;  %v115_v16 = vmul.f32 0.00390625, %v103_v62 }
  0x9f   :  { %v114_v22 = vmul.f32 0.00390625, %v100_v63 }
  0xa0   :  { %v166_v56 = vmul.f32 %v915_v53, %v115_v16  ;;  %v161_v16 = vmul.f32 %v909_v52, %v110_v47  ;;  %v170_v47 = vsel %vm134_vm0, %v162_v10, 0.0 }
  0xa1   :  { %v74_v17 = vpop.xlane.xlu1 %73  ;;  %v165_v58 = vmul.f32 %v909_v52, %v114_v22 }
  0xa2   :  { %v84_v23 = vmul.f32 0.00390625, %v74_v17  ;;  %v62_v28 = vpop.xlane.xlu0 %61  ;;  %v183_v22 = vsel %vm134_vm0, %v166_v56, 0.0  ;;  %v169_v30 = vsel %vm134_vm0, %v161_v16, 0.0 }
  0xa3   :  { %v80_v29 = vmul.f32 0.00390625, %v62_v28  ;;  %v182_v28 = vsel %vm134_vm0, %v165_v58, 0.0 }
  0xa4   :  { %v132_v59 = vmul.f32 %v892_v49, %v84_v23  ;;  %v184_v58 = vadd.f32 %v183_v22, %v182_v28 }
  0xa5   :  { %v106_v57 = vpop.xlane.xlu1 %105  ;;  %v128_v3 = vmul.f32 %v892_v49, %v80_v29 }
  0xa6   :  { %v116_v62 = vmul.f32 0.00390625, %v106_v57  ;;  %v94_v63 = vpop.xlane.xlu0 %93  ;;  %v151_v29 = vsel %vm134_vm0, %v132_v59, 0.0 }
  0xa7   :  { %v112_v17 = vmul.f32 0.00390625, %v94_v63  ;;  %v138_v40 = vsel %vm134_vm0, %v128_v3, 0.0  ;;  %v152_v21 = vadd.f32 %v151_v29, %v150_v35 }
  0xa8   :  { %v167_v57 = vmul.f32 %v921_v54, %v116_v62 }
  0xa9   :  { %v77_v23 = vpop.xlane.xlu1 %76  ;;  %v163_v41 = vmul.f32 %v921_v54, %v112_v17 }
  0xaa   :  { %v85_v34 = vmul.f32 0.00390625, %v77_v23  ;;  %v65_v63 = vpop.xlane.xlu0 %64  ;;  %v139_v23 = vadd.f32 %v138_v40, %v137_v46  ;;  %v185_v60 = vsel %vm134_vm0, %v167_v57, 0.0 }
  0xab   :  { %v81_v31 = vmul.f32 0.00390625, %v65_v63  ;;  %v172_v61 = vsel %vm134_vm0, %v163_v41, 0.0  ;;  %v171_v63 = vadd.f32 %v170_v47, %v169_v30  ;;  %v186_v28 = vadd.f32 %v185_v60, %v184_v58 }
  0xac   :  { %v133_v56 = vmul.f32 %v903_v51, %v85_v34 }
  0xad   :  { %v129_v59 = vmul.f32 %v903_v51, %v81_v31  ;;  %v109_v62 = vpop.xlane.xlu1 %108  ;;  %v173_v35 = vadd.f32 %v172_v61, %v171_v63 }
  0xae   :  { %v153_v3 = vsel %vm134_vm0, %v133_v56, 0.0  ;;  %v117_v7 = vmul.f32 0.00390625, %v109_v62  ;;  %v97_v17 = vpop.xlane.xlu0 %96 }
  0xaf   :  { %v154_v11 = vadd.f32 %v153_v3, %v152_v21  ;;  %v140_v10 = vsel %vm134_vm0, %v129_v59, 0.0  ;;  %v113_v34 = vmul.f32 0.00390625, %v97_v17 }
  0xb0   :  { %v141_v16 = vadd.f32 %v140_v10, %v139_v23  ;;  %v168_v22 = vmul.f32 %v927_v55, %v117_v7 }
  0xb1   :  { %v155_v31 = vrot.slane %v154_v11, 4  ;;  %v164_v29 = vmul.f32 %v927_v55, %v113_v34 }
  0xb2   :  { %v142_v57 = vrot.slane %v141_v16, 4  ;;  %v187_v40 = vsel %vm134_vm0, %v168_v22, 0.0  ;;  %v202_v22 = vlaneseq }
  0xb3   :  { %v156_v46 = vadd.f32 %v155_v31, %v154_v11  ;;  %v188_v56 = vadd.f32 %v187_v40, %v186_v28  ;;  %v174_v41 = vsel %vm134_vm0, %v164_v29, 0.0  ;;  %v217_v29 = vpop.permute.xlu1 %216  ;;  %v197_v40 = vld [vmem:[%s1130_s4] sm:$0x1] }
  0xb4   :  { %v143_v21 = vadd.f32 %v142_v57, %v141_v16  ;;  %v175_v62 = vadd.f32 %v174_v41, %v173_v35 }
  0xb5   :  { %v157_v59 = vrot.slane %v156_v46, 2  ;;  %v189_v3 = vrot.slane %v188_v56, 4 }
  0xb6   :  { %v144_v30 = vrot.slane %v143_v21, 2  ;;  %v176_v47 = vrot.slane %v175_v62, 4 }
  0xb7   :  { %v158_v23 = vadd.f32 %v157_v59, %v156_v46  ;;  %v190_v7 = vadd.f32 %v189_v3, %v188_v56  ;;  %v203_v46 = vshrl.u32 %v202_v22, 7 }
  0xb8   :  { %v145_v58 = vadd.f32 %v144_v30, %v143_v21  ;;  %v177_v60 = vadd.f32 %v176_v47, %v175_v62  ;;  %v219_v30 = vpop.permute.xlu1 %218 }
  0xb9   :  { %v191_v17 = vrot.slane %v190_v7, 2  ;;  %v159_v61 = vrot.slane %v158_v23, 1  ;;  %v204_v59 = vsub.s32 0, %v203_v46 }
  0xba   :  { %v178_v10 = vrot.slane %v177_v60, 2  ;;  %v146_v63 = vrot.slane %v145_v58, 1 }
  0xbb   :  { %v192_v34 = vadd.f32 %v191_v17, %v190_v7  ;;  %v160_v16 = vadd.f32 %v159_v61, %v158_v23 }
  0xbc   :  { %v179_v11 = vadd.f32 %v178_v10, %v177_v60  ;;  %v147_v57 = vadd.f32 %v146_v63, %v145_v58  ;;  %v215_v10 = vpop.permute.xlu0 %214  ;;  %v221_v61 = vpop.permute.xlu1 %220 }
  0xbd   :  { %v193_v28 = vrot.slane %v192_v34, 1 }
  0xbe   :  { %v180_v31 = vrot.slane %v179_v11, 1 }
  0xbf   :  { %v194_v35 = vadd.f32 %v193_v28, %v192_v34 }
  0xc0   :  { %v181_v56 = vadd.f32 %v180_v31, %v179_v11  ;;  %v321_v11 = vpop.permute.xlu1 %320 }
  0xc1   :  { %v196_v41 = vadd.f32 %v194_v35, %v160_v16 }
  0xc2   :  { %v195_v21 = vadd.f32 %v181_v56, %v147_v57 }
  0xc3   :  { %v199_v62 = vadd.f32 %v197_v40, %v196_v41 }
  0xc4   :  { %v198_v3 = vadd.f32 %v197_v40, %v195_v21  ;;  %v325_v41 = vpop.permute.xlu1 %324  ;;  %v319_v21 = vpop.permute.xlu0 %318 }
  0xc5   :  { %v201_v47 = vmax.f32 %v199_v62, 0.0 }
  0xc6   :  { %v200_v7 = vmax.f32 %v198_v3, 0.0 }
  0xc7   :  { %v209_v17 = vrot.slane %v201_v47, %v204_v59 }
  0xc8   :  { %v205_v60 = vrot.slane %v200_v7, %v204_v59 }
  0xc9   :  { %v231_v34 = vmul.f32 %v217_v29, %v209_v17  ;;  %v233_v16 = vmul.f32 %v221_v61, %v209_v17  ;;  %v230_v40 = vmul.f32 %v215_v10, %v209_v17  ;;  %v232_v62 = vmul.f32 %v219_v30, %v209_v17 }
  0xca   :  { %v227_v23 = vmul.f32 %v217_v29, %v205_v60  ;;  %v226_v58 = vmul.f32 %v215_v10, %v205_v60  ;;  %v228_v63 = vmul.f32 %v219_v30, %v205_v60  ;;  %v229_v31 = vmul.f32 %v221_v61, %v205_v60 }
  0xcb   :  { %v249_v35 = vsel %vm134_vm0, %v231_v34, 0.0  ;;  %v331_v46 = vmul.f32 %v321_v11, %v205_v60  ;;  %v255_v29 = vsel %vm134_vm0, %v233_v16, 0.0  ;;  %v333_v59 = vmul.f32 %v325_v41, %v205_v60 }
  0xcc   :  { %v237_v28 = vsel %vm134_vm0, %v227_v23, 0.0  ;;  %v234_v22 = vsel %vm134_vm0, %v226_v58, 0.0  ;;  %v240_v57 = vsel %vm134_vm0, %v228_v63, 0.0  ;;  %v243_v56 = vsel %vm134_vm0, %v229_v31, 0.0  ;;  %v323_v58 = vpop.permute.xlu0 %322 }
  0xcd   :  { %238 = vadd.xlane.f32.xlu1 %v237_v28  ;;  %235 = vadd.xlane.f32.xlu0 %v234_v22  ;;  %v341_v3 = vsel %vm134_vm0, %v331_v46, 0.0  ;;  %v246_v47 = vsel %vm134_vm0, %v230_v40, 0.0  ;;  %v335_v7 = vmul.f32 %v321_v11, %v209_v17  ;;  %v330_v23 = vmul.f32 %v319_v21, %v205_v60 }
  0xce   :  { %v347_v10 = vsel %vm134_vm0, %v333_v59, 0.0  ;;  %v252_v61 = vsel %vm134_vm0, %v232_v62, 0.0  ;;  %v337_v34 = vmul.f32 %v325_v41, %v209_v17  ;;  %v332_v63 = vmul.f32 %v323_v58, %v205_v60 }
  0xcf   :  { %v353_v30 = vsel %vm134_vm0, %v335_v7, 0.0  ;;  %v338_v28 = vsel %vm134_vm0, %v330_v23, 0.0  ;;  %v334_v22 = vmul.f32 %v319_v21, %v209_v17  ;;  %v336_v16 = vmul.f32 %v323_v58, %v209_v17 }
  0xd0   :  { %v359_v31 = vsel %vm134_vm0, %v337_v34, 0.0  ;;  %v344_v11 = vsel %vm134_vm0, %v332_v63, 0.0  ;;  %v655_v60 = vmov 8  }
  0xd1   :  { %250 = vadd.xlane.f32.xlu1 %v249_v35  ;;  %241 = vadd.xlane.f32.xlu0 %v240_v57  ;;  %v350_v35 = vsel %vm134_vm0, %v334_v22, 0.0  ;;  %v356_v57 = vsel %vm134_vm0, %v336_v16, 0.0 }
  0xd2   :  { %589 = vset.pattern.permute.xlu1 %v655_v60  ;;  %588 = vset.pattern.permute.xlu0 %v655_v60 }
  0xd5   :  { %256 = vadd.xlane.f32.xlu1 %v255_v29  ;;  %244 = vadd.xlane.f32.xlu0 %v243_v56 }
  0xd9   :  { %342 = vadd.xlane.f32.xlu1 %v341_v3  ;;  %247 = vadd.xlane.f32.xlu0 %v246_v47 }
  0xdd   :  { %348 = vadd.xlane.f32.xlu1 %v347_v10  ;;  %253 = vadd.xlane.f32.xlu0 %v252_v61 }
  0xe1   :  { %354 = vadd.xlane.f32.xlu1 %v353_v30  ;;  %339 = vadd.xlane.f32.xlu0 %v338_v28 }
  0xe5   :  { %360 = vadd.xlane.f32.xlu1 %v359_v31  ;;  %345 = vadd.xlane.f32.xlu0 %v344_v11 }
  0xe9   :  { %351 = vadd.xlane.f32.xlu0 %v350_v35 }
  0xed   :  { %357 = vadd.xlane.f32.xlu0 %v356_v57 }
 0x15a   :  { %v239_v40 = vpop.xlane.xlu1 %238  ;;  %v236_v46 = vpop.xlane.xlu0 %235 }
 0x15b   :  { %v259_v29 = vadd.f32 %v239_v40, %v886_v48  ;;  %v258_v56 = vadd.f32 %v236_v46, %v897_v50 }
 0x15d   :  { %v571_v41 = vmul.f32 -1.442695, %v259_v29  ;;  %v570_v21 = vmul.f32 -1.442695, %v258_v56 }
 0x15e   :  { %v251_v62 = vpop.xlane.xlu1 %250  ;;  %v242_v59 = vpop.xlane.xlu0 %241 }
 0x15f   :  { %590 = vpow2.f32 %v571_v41  ;;  %v260_v17 = vadd.f32 %v242_v59, %v892_v49  ;;  %v263_v47 = vadd.f32 %v251_v62, %v886_v48 }
 0x160   :  { %592 = vpow2.f32 %v570_v21 }
 0x161   :  { %v572_v3 = vmul.f32 -1.442695, %v260_v17  ;;  %v575_v58 = vmul.f32 -1.442695, %v263_v47 }
 0x162   :  { %v257_v7 = vpop.xlane.xlu1 %256  ;;  %v245_v23 = vpop.xlane.xlu0 %244 }
 0x163   :  { %v261_v10 = vadd.f32 %v245_v23, %v903_v51  ;;  %594 = vpow2.f32 %v572_v3 }
 0x165   :  { %v573_v61 = vmul.f32 -1.442695, %v261_v10 }
 0x166   :  { %v343_v34 = vpop.xlane.xlu1 %342  ;;  %v248_v63 = vpop.xlane.xlu0 %247 }
 0x167   :  { %v363_v30 = vadd.f32 %v343_v34, %v915_v53  ;;  %v262_v28 = vadd.f32 %v248_v63, %v897_v50  ;;  %596 = vpow2.f32 %v573_v61  ;;  %v265_v50 = vadd.f32 %v257_v7, %v903_v51 }
 0x168   :  { %598 = vpow2.f32 %v575_v58 }
 0x169   :  { %v591_v22 = vpop.eup %590  ;;  %v579_v31 = vmul.f32 -1.442695, %v363_v30  ;;  %v574_v48 = vmul.f32 -1.442695, %v262_v28  ;;  %v577_v23 = vmul.f32 -1.442695, %v265_v50 }
 0x16a   :  { %v593_v11 = vpop.eup %592  ;;  %v291_v16 = vadd.f32 1.0, %v591_v22  ;;  %v349_v35 = vpop.xlane.xlu1 %348 }
 0x16b   :  { %v254_v57 = vpop.xlane.xlu0 %253  ;;  %v290_v60 = vadd.f32 1.0, %v593_v11  ;;  %600 = vpow2.f32 %v579_v31  ;;  %v365_v40 = vadd.f32 %v349_v35, %v927_v55 }
 0x16c   :  { %v264_v46 = vadd.f32 %v254_v57, %v892_v49  ;;  %602 = vrcp.f32 %v291_v16 }
 0x16d   :  { %604 = vrcp.f32 %v290_v60  ;;  %v581_v29 = vmul.f32 -1.442695, %v365_v40  ;;  %v595_v56 = vpop.eup %594 }
 0x16e   :  { %606 = vpow2.f32 %v574_v48  ;;  %v576_v41 = vmul.f32 -1.442695, %v264_v46  ;;  %v355_v21 = vpop.xlane.xlu1 %354  ;;  %v292_v59 = vadd.f32 1.0, %v595_v56 }
 0x16f   :  { %v340_v62 = vpop.xlane.xlu0 %339  ;;  %608 = vpow2.f32 %v581_v29  ;;  %v367_v17 = vadd.f32 %v355_v21, %v915_v53 }
 0x170   :  { %610 = vrcp.f32 %v292_v59  ;;  %v362_v49 = vadd.f32 %v340_v62, %v909_v52 }
 0x171   :  { %v583_v3 = vmul.f32 -1.442695, %v367_v17  ;;  %v597_v47 = vpop.eup %596  ;;  %612 = vpow2.f32 %v576_v41 }
 0x172   :  { %v361_v10 = vpop.xlane.xlu1 %360  ;;  %v293_v58 = vadd.f32 1.0, %v597_v47  ;;  %v599_v7 = vpop.eup %598  ;;  %v578_v28 = vmul.f32 -1.442695, %v362_v49 }
 0x173   :  { %v346_v61 = vpop.xlane.xlu0 %345  ;;  %614 = vpow2.f32 %v583_v3  ;;  %v369_v51 = vadd.f32 %v361_v10, %v927_v55  ;;  %v295_v46 = vadd.f32 1.0, %v599_v7 }
 0x174   :  { %616 = vrcp.f32 %v293_v58  ;;  %v364_v22 = vadd.f32 %v346_v61, %v921_v54 }
 0x175   :  { %v601_v34 = vpop.eup %600  ;;  %v585_v63 = vmul.f32 -1.442695, %v369_v51  ;;  %618 = vpow2.f32 %v577_v23 }
 0x176   :  { %v603_v30 = vpop.eup %602  ;;  %v395_v53 = vadd.f32 1.0, %v601_v34  ;;  %v580_v57 = vmul.f32 -1.442695, %v364_v22 }
 0x177   :  { %v352_v31 = vpop.xlane.xlu0 %351  ;;  %v605_v11 = vpop.eup %604  ;;  %620 = vpow2.f32 %v585_v63  ;;  %425 = vperm.xlu1 %589, %v603_v30  }
 0x178   :  { %v607_v16 = vpop.eup %606  ;;  %622 = vrcp.f32 %v395_v53  ;;  %420 = vperm.xlu0 %588, %v605_v11   ;;  %v366_v60 = vadd.f32 %v352_v31, %v909_v52 }
 0x179   :  { %v609_v48 = vpop.eup %608  ;;  %v294_v35 = vadd.f32 1.0, %v607_v16  ;;  %624 = vpow2.f32 %v578_v28 }
 0x17a   :  { %v397_v55 = vadd.f32 1.0, %v609_v48  ;;  %v611_v40 = vpop.eup %610  ;;  %v582_v21 = vmul.f32 -1.442695, %v366_v60 }
 0x17b   :  { %626 = vrcp.f32 %v294_v35  ;;  %v358_v29 = vpop.xlane.xlu0 %357  ;;  %v613_v56 = vpop.eup %612  ;;  %430 = vperm.xlu1 %589, %v611_v40  }
 0x17c   :  { %628 = vrcp.f32 %v397_v55  ;;  %v368_v62 = vadd.f32 %v358_v29, %v921_v54  ;;  %v296_v17 = vadd.f32 1.0, %v613_v56 }
 0x17d   :  { %v615_v50 = vpop.eup %614  ;;  %630 = vpow2.f32 %v580_v57 }
 0x17e   :  { %v399_v41 = vadd.f32 1.0, %v615_v50  ;;  %v617_v59 = vpop.eup %616  ;;  %632 = vrcp.f32 %v295_v46  ;;  %v584_v49 = vmul.f32 -1.442695, %v368_v62 }
 0x17f   :  { %v619_v3 = vpop.eup %618  ;;  %435 = vperm.xlu1 %589, %v617_v59  }
 0x180   :  { %634 = vrcp.f32 %v399_v41  ;;  %v297_v10 = vadd.f32 1.0, %v619_v3 }
 0x181   :  { %v621_v52 = vpop.eup %620  ;;  %636 = vpow2.f32 %v582_v21 }
 0x182   :  { %v623_v47 = vpop.eup %622  ;;  %v401_v23 = vadd.f32 1.0, %v621_v52  ;;  %638 = vrcp.f32 %v296_v17 }
 0x183   :  { %497 = vperm.xlu0 %588, %v623_v47   ;;  %v625_v61 = vpop.eup %624 }
 0x184   :  { %640 = vrcp.f32 %v401_v23  ;;  %v394_v54 = vadd.f32 1.0, %v625_v61 }
 0x185   :  { %v627_v58 = vpop.eup %626  ;;  %642 = vpow2.f32 %v584_v49 }
 0x186   :  { %v629_v51 = vpop.eup %628  ;;  %440 = vperm.xlu1 %589, %v627_v58   ;;  %644 = vrcp.f32 %v297_v10 }
 0x187   :  { %507 = vperm.xlu0 %588, %v629_v51   ;;  %v631_v7 = vpop.eup %630  ;;  %646 = vrcp.f32 %v394_v54  ;;  %v1139_v51 = vld [vmem:[#allocation2_spill] sm:$0xff] }
 0x188   :  { %v633_v34 = vpop.eup %632  ;;  %v396_v30 = vadd.f32 1.0, %v631_v7 }
 0x18a   :  { %v635_v63 = vpop.eup %634  ;;  %445 = vperm.xlu1 %589, %v633_v34   ;;  %648 = vrcp.f32 %v396_v30  ;;  %v1141_v34 = vld [vmem:[#allocation4_spill] sm:$0xff] }
 0x18b   :  { %517 = vperm.xlu0 %588, %v635_v63   ;;  %v637_v53 = vpop.eup %636 }
 0x18c   :  { %v639_v28 = vpop.eup %638  ;;  %v398_v31 = vadd.f32 1.0, %v637_v53 }
 0x18e   :  { %v641_v22 = vpop.eup %640  ;;  %450 = vperm.xlu1 %589, %v639_v28   ;;  %650 = vrcp.f32 %v398_v31 }
 0x18f   :  { %527 = vperm.xlu0 %588, %v641_v22   ;;  %v643_v11 = vpop.eup %642 }
 0x190   :  { %v645_v16 = vpop.eup %644  ;;  %v400_v48 = vadd.f32 1.0, %v643_v11 }
 0x191   :  { %v647_v35 = vpop.eup %646 }
 0x192   :  { %455 = vperm.xlu1 %589, %v645_v16   ;;  %652 = vrcp.f32 %v400_v48 }
 0x194   :  { %v649_v55 = vpop.eup %648 }
 0x196   :  { %492 = vperm.xlu1 %589, %v647_v35  }
 0x198   :  { %v651_v57 = vpop.eup %650 }
 0x19a   :  { %502 = vperm.xlu1 %589, %v649_v55  }
 0x19c   :  { %v653_v60 = vpop.eup %652 }
 0x19e   :  { %512 = vperm.xlu1 %589, %v651_v57  }
 0x1a2   :  { %522 = vperm.xlu1 %589, %v653_v60  }
 0x1f6   :  { %v426_v40 = vpop.permute.xlu1 %425 }
 0x1f7   :  { %v460_v46 = vmul.f32 %v426_v40, %v728_v8  ;;  %v461_v29 = vmul.f32 %v426_v40, %v733_v9  ;;  %v421_v56 = vpop.permute.xlu0 %420 }
 0x1f8   :  { %v458_v50 = vmul.f32 %v421_v56, %v704_v2  ;;  %v459_v41 = vmul.f32 %v421_v56, %v711_v4 }
 0x1f9   :  { %476 = vst [vmem:[%s1131_s5 + $0x10] sm:$0xff] %v460_v46  ;;  %477 = vst [vmem:[%s1131_s5 + $0x18] sm:$0xff] %v461_v29 }
 0x1fa   :  { %474 = vst [vmem:[%s1131_s5] sm:$0xff] %v458_v50  ;;  %475 = vst [vmem:[%s1131_s5 + $0x8] sm:$0xff] %v459_v41  ;;  %v431_v8 = vpop.permute.xlu1 %430 }
 0x1fb   :  { %v462_v2 = vmul.f32 %v431_v8, %v800_v26  ;;  %v463_v4 = vmul.f32 %v431_v8, %v805_v27 }
 0x1fd   :  { %478 = vst [vmem:[%s1131_s5 + $0x20] sm:$0xff] %v462_v2  ;;  %479 = vst [vmem:[%s1131_s5 + $0x28] sm:$0xff] %v463_v4 }
 0x1fe   :  { %v436_v9 = vpop.permute.xlu1 %435 }
 0x1ff   :  { %v464_v21 = vmul.f32 %v436_v9, %v848_v38  ;;  %v465_v62 = vmul.f32 %v436_v9, %v853_v39 }
 0x201   :  { %480 = vst [vmem:[%s1131_s5 + $0x30] sm:$0xff] %v464_v21  ;;  %481 = vst [vmem:[%s1131_s5 + $0x38] sm:$0xff] %v465_v62 }
 0x202   :  { %v498_v26 = vpop.permute.xlu0 %497 }
 0x203   :  { %v532_v27 = vmul.f32 %v498_v26, %v742_v12  ;;  %v533_v59 = vmul.f32 %v498_v26, %v747_v13 }
 0x205   :  { %v441_v17 = vpop.permute.xlu1 %440  ;;  %548 = vst [vmem:[%s1132_s6 + $0x10] sm:$0xff] %v532_v27  ;;  %549 = vst [vmem:[%s1132_s6 + $0x18] sm:$0xff] %v533_v59 }
 0x206   :  { %v466_v38 = vmul.f32 %v441_v17, %v694_v0  ;;  %v467_v39 = vmul.f32 %v441_v17, %v699_v1  ;;  %v508_v3 = vpop.permute.xlu0 %507 }
 0x207   :  { %v536_v52 = vmul.f32 %v508_v3, %v872_v44  ;;  %v537_v12 = vmul.f32 %v508_v3, %v877_v45 }
 0x208   :  { %482 = vst [vmem:[%s1131_s5 + $0x40] sm:$0xff] %v466_v38  ;;  %483 = vst [vmem:[%s1131_s5 + $0x48] sm:$0xff] %v467_v39 }
 0x209   :  { %v446_v13 = vpop.permute.xlu1 %445  ;;  %552 = vst [vmem:[%s1132_s6 + $0x30] sm:$0xff] %v536_v52  ;;  %553 = vst [vmem:[%s1132_s6 + $0x38] sm:$0xff] %v537_v12 }
 0x20a   :  { %v468_v0 = vmul.f32 %v446_v13, %v716_v5  ;;  %v469_v1 = vmul.f32 %v446_v13, %v721_v6  ;;  %v518_v44 = vpop.permute.xlu0 %517 }
 0x20b   :  { %v540_v45 = vmul.f32 %v518_v44, %v766_v18  ;;  %v541_v47 = vmul.f32 %v518_v44, %v771_v19 }
 0x20c   :  { %484 = vst [vmem:[%s1131_s5 + $0x50] sm:$0xff] %v468_v0  ;;  %485 = vst [vmem:[%s1131_s5 + $0x58] sm:$0xff] %v469_v1 }
 0x20d   :  { %v451_v23 = vpop.permute.xlu1 %450  ;;  %556 = vst [vmem:[%s1132_s6 + $0x50] sm:$0xff] %v540_v45  ;;  %557 = vst [vmem:[%s1132_s6 + $0x58] sm:$0xff] %v541_v47 }
 0x20e   :  { %v470_v5 = vmul.f32 %v451_v23, %v790_v24  ;;  %v471_v6 = vmul.f32 %v451_v23, %v795_v25  ;;  %v528_v18 = vpop.permute.xlu0 %527 }
 0x20f   :  { %v544_v19 = vmul.f32 %v528_v18, %v862_v42  ;;  %v545_v49 = vmul.f32 %v528_v18, %v867_v43 }
 0x210   :  { %486 = vst [vmem:[%s1131_s5 + $0x60] sm:$0xff] %v470_v5  ;;  %487 = vst [vmem:[%s1131_s5 + $0x68] sm:$0xff] %v471_v6 }
 0x211   :  { %v456_v10 = vpop.permute.xlu1 %455  ;;  %560 = vst [vmem:[%s1132_s6 + $0x70] sm:$0xff] %v544_v19  ;;  %561 = vst [vmem:[%s1132_s6 + $0x78] sm:$0xff] %v545_v49 }
 0x212   :  { %v472_v24 = vmul.f32 %v456_v10, %v838_v36  ;;  %v473_v25 = vmul.f32 %v456_v10, %v843_v37 }
 0x214   :  { %488 = vst [vmem:[%s1131_s5 + $0x70] sm:$0xff] %v472_v24  ;;  %489 = vst [vmem:[%s1131_s5 + $0x78] sm:$0xff] %v473_v25 }
 0x215   :  { %v493_v42 = vpop.permute.xlu1 %492 }
 0x216   :  { %v530_v43 = vmul.f32 %v493_v42, %v752_v14  ;;  %v531_v61 = vmul.f32 %v493_v42, %v757_v15 }
 0x218   :  { %546 = vst [vmem:[%s1132_s6] sm:$0xff] %v530_v43  ;;  %547 = vst [vmem:[%s1132_s6 + $0x8] sm:$0xff] %v531_v61 }
 0x219   :  { %v503_v36 = vpop.permute.xlu1 %502 }
 0x21a   :  { %v534_v37 = vmul.f32 %v503_v36, %v824_v32  ;;  %v535_v58 = vmul.f32 %v503_v36, %v829_v33  ;;  %v1140_v33 = vld [vmem:[#allocation3_spill] sm:$0xff] }
 0x21c   :  { %550 = vst [vmem:[%s1132_s6 + $0x20] sm:$0xff] %v534_v37  ;;  %551 = vst [vmem:[%s1132_s6 + $0x28] sm:$0xff] %v535_v58 }
 0x21d   :  { %v513_v14 = vpop.permute.xlu1 %512 }
 0x21e   :  { %v538_v15 = vmul.f32 %v513_v14, %v776_v20  ;;  %v539_v54 = vmul.f32 %v513_v14, %v1139_v51 }
 0x220   :  { %554 = vst [vmem:[%s1132_s6 + $0x40] sm:$0xff] %v538_v15  ;;  %555 = vst [vmem:[%s1132_s6 + $0x48] sm:$0xff] %v539_v54 }
 0x221   :  { %v523_v32 = vpop.permute.xlu1 %522 }
 0x222   :  { %v542_v7 = vmul.f32 %v523_v32, %v1140_v33  ;;  %v543_v63 = vmul.f32 %v523_v32, %v1141_v34 }
 0x224   :  { %558 = vst [vmem:[%s1132_s6 + $0x60] sm:$0xff] %v542_v7  ;;  %559 = vst [vmem:[%s1132_s6 + $0x68] sm:$0xff] %v543_v63 }

</bundles_post_ra>
